<compile_context>
chip_gen: v5e
topology: v5e:2x2
jax: 0.10.0
libtpu: 0.0.40
codegen_flags: <defaults>
</compile_context>

<pallas_src>
import jax
import jax.numpy as jnp
from jax.experimental import pallas as pl
from jax.experimental.pallas import tpu as pltpu


# ---------------------------------------------------------------------------
# Tile-selection helpers.
# ---------------------------------------------------------------------------
_TILE_F32_ELEMS = (2 * 1024 * 1024) // 4      # ~2 MiB of f32 per input tile


def _vmem_capacity_bytes():
    try:
        return int(pltpu.get_tpu_info().vmem_capacity_bytes)
    except Exception:
        return 64 * 1024 * 1024                # v7x per-TC (most restrictive)


def _vmem_limit_bytes():
    cap = _vmem_capacity_bytes()
    # Leave >= 16 MiB headroom for Mosaic internal scratch / regalloc; the
    # ~2 MiB tile cap keeps actual usage far below this anyway.
    return int(max(16 << 20, min(cap - (16 << 20), 64 << 20)))


def _pick_tile(total, quantum, max_tile):
    """Largest divisor of `total` that is <= max_tile, preferring multiples of
    `quantum`; returns `total` when it already fits."""
    if total <= max_tile:
        return total
    t = (max_tile // quantum) * quantum
    while t >= quantum:
        if total % t == 0:
            return t
        t -= quantum
    for t in range(min(max_tile, total), 0, -1):
        if total % t == 0:
            return t
    return total


def _row_tile(total, max_tile):
    """Sublane tile: multiple of 8 or the whole dim (layout-legal)."""
    t = _pick_tile(total, 8, max_tile)
    if t != total and t % 8 != 0:
        # TODO(synk): masked tail handling for awkward row counts; whole dim is
        # always correct and layout-legal, just less pipelined.
        return total
    return t


def _choose_lane_width(total_lanes):
    """Lane width: a multiple of 128 dividing L, preferring 512."""
    for w in (512, 1024, 2048, 4096, 8192, 256, 128):
        if total_lanes % w == 0:
            return w
    for w in range(8192, 127, -128):
        if total_lanes % w == 0:
            return w
    return None


# ---------------------------------------------------------------------------
# BCE-with-logits + Dice per-row partial-sum kernel.
# ---------------------------------------------------------------------------
def _bce_dice_kernel(pred_ref, tgt_ref, out_ref,
                     inter_acc, sp_acc, st_acc, bce_acc):
    c = pl.program_id(1)
    nc = pl.num_programs(1)

    @pl.when(c == 0)
    def _():
        inter_acc[...] = jnp.zeros_like(inter_acc)
        sp_acc[...] = jnp.zeros_like(sp_acc)
        st_acc[...] = jnp.zeros_like(st_acc)
        bce_acc[...] = jnp.zeros_like(bce_acc)

    x = pred_ref[...].astype(jnp.float32)        # (S, Wl) logits
    t = tgt_ref[...].astype(jnp.float32)         # (S, Wl) targets

    # Stable BCE-with-logits; exp(-|x|) is reused by the sigmoid below.
    e = jnp.exp(-jnp.abs(x))
    bce = jnp.maximum(x, 0.0) - x * t + jnp.log1p(e)

    # sigmoid(x) = where(x >= 0, 1, e) / (1 + e): EUP approx reciprocal plus
    # one Newton refinement step instead of an exact multi-op VALU divide.
    d = 1.0 + e
    inv = pl.reciprocal(d, approx=True)
    inv = inv * (2.0 - d * inv)
    p = jnp.where(x >= 0.0, 1.0, e) * inv

    s_dim, w_dim = x.shape

    def lane_strip_sum(v):
        # (S, Wl) -> (S, 128) partials via vreg-aligned lane strips (pure VPU
        # adds); XLU fallback only for lane widths not a multiple of 128.
        if w_dim % 128 == 0:
            s = v[:, 0:128]
            for g in range(1, w_dim // 128):
                s = s + v[:, g * 128:(g + 1) * 128]
            return s
        col = jax.lax.broadcasted_iota(jnp.int32, (s_dim, 128), 1)
        return jnp.where(col == 0, jnp.sum(v, axis=1, keepdims=True), 0.0)

    inter_acc[...] += lane_strip_sum(p * t)
    sp_acc[...] += lane_strip_sum(p)
    st_acc[...] += lane_strip_sum(t)
    bce_acc[...] += lane_strip_sum(bce)

    # Single XLU reduce per row, only on the last chunk; lane-dense (8, 128)
    # block carrying [sum p*t, sum p, sum t, sum bce] in lanes 0..3 of row 0.
    @pl.when(c == nc - 1)
    def _():
        inter = jnp.sum(inter_acc[...])
        sp = jnp.sum(sp_acc[...])
        st = jnp.sum(st_acc[...])
        bce_s = jnp.sum(bce_acc[...])
        row = jax.lax.broadcasted_iota(jnp.int32, out_ref.shape, 0)
        col = jax.lax.broadcasted_iota(jnp.int32, out_ref.shape, 1)
        blk = jnp.where((row == 0) & (col == 0), inter, 0.0)
        blk = jnp.where((row == 0) & (col == 1), sp, blk)
        blk = jnp.where((row == 0) & (col == 2), st, blk)
        blk = jnp.where((row == 0) & (col == 3), bce_s, blk)
        out_ref[...] = blk


def _bce_dice_row_partials(pred_seg, target_seg):
    R = pred_seg.shape[0]
    L = 1
    for d in pred_seg.shape[1:]:
        L *= d

    Wl = _choose_lane_width(L)
    if Wl is None:
        # TODO(synk): L with no multiple-of-128 divisor -> whole row in one
        # lane tile (kernel takes the XLU fallback path). Fine for small L.
        Wl, P, S = L, 1, 1
    else:
        P = L // Wl
        max_sub = max(1, _TILE_F32_ELEMS // Wl)    # cap in-kernel f32 bytes
        S = _row_tile(P, max_sub)

    pred3 = pred_seg.reshape(R, P, Wl)   # native dtype: no f32 up-cast in HBM
    tgt3 = target_seg.reshape(R, P, Wl)

    out = pl.pallas_call(
        _bce_dice_kernel,
        out_shape=jax.ShapeDtypeStruct((R, 8, 128), jnp.float32),
        grid_spec=pltpu.PrefetchScalarGridSpec(
            num_scalar_prefetch=0,
            grid=(R, P // S),
            in_specs=[
                pl.BlockSpec((None, S, Wl), lambda r, c: (r, c, 0)),
                pl.BlockSpec((None, S, Wl), lambda r, c: (r, c, 0)),
            ],
            out_specs=pl.BlockSpec((None, 8, 128), lambda r, c: (r, 0, 0)),
            scratch_shapes=[
                pltpu.VMEM((S, 128), jnp.float32),   # sum sigmoid(x) * t
                pltpu.VMEM((S, 128), jnp.float32),   # sum sigmoid(x)
                pltpu.VMEM((S, 128), jnp.float32),   # sum t
                pltpu.VMEM((S, 128), jnp.float32),   # sum bce
            ]),
        compiler_params=pltpu.CompilerParams(
            dimension_semantics=("parallel", "arbitrary"),
            vmem_limit_bytes=_vmem_limit_bytes()),
    )(pred3, tgt3)

    inter = out[:, 0, 0]
    sp = out[:, 0, 1]
    st = out[:, 0, 2]
    bce_sum = out[:, 0, 3]
    return inter, sp, st, bce_sum, R, L


def bce_dice_loss(pred_seg, target_seg, smooth=1e-5):
    """Matches PyTorch BCEDiceLoss.forward: 0.9 * BCEWithLogits + 0.1 * Dice."""
    inter, sp, st, bce_sum, R, L = _bce_dice_row_partials(pred_seg, target_seg)
    bce_mean = jnp.sum(bce_sum) / jnp.float32(R * L)
    dice = (2.0 * inter + smooth) / (sp + st + smooth)     # per-row, tiny
    dice_loss = 1.0 - jnp.sum(dice) / jnp.float32(R)
    return 0.9 * bce_mean + 0.1 * dice_loss


# ---------------------------------------------------------------------------
# CrossEntropyLoss kernel (logits [N, K], integer class targets [N]).
# ---------------------------------------------------------------------------
def _cross_entropy_kernel(logits_ref, tgt_ref, out_ref):
    x = logits_ref[...].astype(jnp.float32)           # (TN, K)
    t = tgt_ref[...]                                   # (TN, 1) int32
    m = jnp.max(x, axis=1, keepdims=True)
    lse = m + jnp.log(jnp.sum(jnp.exp(x - m), axis=1, keepdims=True))
    col = jax.lax.broadcasted_iota(jnp.int32, x.shape, 1)
    # Note: out-of-range targets silently yield picked = 0 (loss = lse); the
    # PyTorch module would raise instead.
    picked = jnp.sum(jnp.where(col == t, x, 0.0), axis=1, keepdims=True)
    nll = lse - picked                                  # (TN, 1)
    out_ref[...] = jnp.broadcast_to(nll, out_ref.shape)  # lane-dense store


def cross_entropy_loss(logits, targets):
    N, K = logits.shape
    tgt2 = targets.astype(jnp.int32).reshape(N, 1)
    # TODO(synk): lane-tile the class axis (two-pass logsumexp) for very large K.
    TN = _row_tile(N, max(8, (2 * 1024 * 1024) // max(K * 4, 1)))
    nN = N // TN
    out = pl.pallas_call(
        _cross_entropy_kernel,
        out_shape=jax.ShapeDtypeStruct((N, 128), jnp.float32),
        grid_spec=pltpu.PrefetchScalarGridSpec(
            num_scalar_prefetch=0,
            grid=(nN,),
            in_specs=[
                pl.BlockSpec((TN, K), lambda i: (i, 0)),
                pl.BlockSpec((TN, 1), lambda i: (i, 0)),
            ],
            out_specs=pl.BlockSpec((TN, 128), lambda i: (i, 0))),
        compiler_params=pltpu.CompilerParams(
            dimension_semantics=("parallel",),
            vmem_limit_bytes=_vmem_limit_bytes()),
    )(logits, tgt2)
    return jnp.mean(out[:, 0])


# ---------------------------------------------------------------------------
# CombinedLoss forward.
# ---------------------------------------------------------------------------
def combined_loss(pred_seg, target_seg, pred_small_object, target_small_object,
                  lambda_1=0.1, lambda_2=0.9):
    seg_loss = bce_dice_loss(pred_seg, target_seg)
    small_object_loss = cross_entropy_loss(pred_small_object, target_small_object)
    return lambda_1 * seg_loss + lambda_2 * small_object_loss


# ---------------------------------------------------------------------------
# Pure-JAX reference (mirrors the PyTorch module) and a small self-test.
# ---------------------------------------------------------------------------
def _reference_combined_loss(pred_seg, target_seg, pred_small, target_small,
                             lambda_1=0.1, lambda_2=0.9):
    x = pred_seg.astype(jnp.float32)
    t = target_seg.astype(jnp.float32)
    bce = jnp.mean(jnp.maximum(x, 0.0) - x * t + jnp.log1p(jnp.exp(-jnp.abs(x))))
    p = jax.nn.sigmoid(x)
    B = x.shape[0]
    pf = p.reshape(B, -1)
    tf = t.reshape(B, -1)
    smooth = 1e-5
    inter = jnp.sum(pf * tf, axis=1)
    dice = (2.0 * inter + smooth) / (jnp.sum(pf, axis=1) + jnp.sum(tf, axis=1) + smooth)
    dice_loss = 1.0 - jnp.sum(dice) / B
    seg_loss = 0.9 * bce + 0.1 * dice_loss
    logits = pred_small.astype(jnp.float32)
    lse = jax.scipy.special.logsumexp(logits, axis=1)
    picked = jnp.take_along_axis(
        logits, target_small.astype(jnp.int32)[:, None], axis=1)[:, 0]
    ce = jnp.mean(lse - picked)
    return lambda_1 * seg_loss + lambda_2 * ce


if __name__ == "__main__":
    key = jax.random.PRNGKey(0)
    k1, k2, k3, k4 = jax.random.split(key, 4)
    B, C, H, W = 2, 4, 16, 16
    N, K = 8, 32
    pred_seg = jax.random.normal(k1, (B, C, H, W), dtype=jnp.float32)
    target_seg = (jax.random.uniform(k2, (B, C, H, W)) > 0.5).astype(jnp.float32)
    pred_small = jax.random.normal(k3, (N, K), dtype=jnp.float32)
    target_small = jax.random.randint(k4, (N,), 0, K, dtype=jnp.int32)

    loss = combined_loss(pred_seg, target_seg, pred_small, target_small)
    loss = jax.block_until_ready(loss)

    ref = _reference_combined_loss(pred_seg, target_seg, pred_small, target_small)
    assert jnp.allclose(loss, ref, rtol=1e-5, atol=1e-5), (loss, ref)

    print("KERNEL_OK")
</pallas_src>

<mosaic_0001>
module attributes {stable_mosaic.version = 11 : i64} {
  func.func @_bce_dice_kernel(%arg0: i32, %arg1: i32, %arg2: memref<1x2x512xf32, #tpu.memory_space<vmem>>, %arg3: memref<1x2x512xf32, #tpu.memory_space<vmem>>, %arg4: memref<1x8x128xf32, #tpu.memory_space<vmem>>, %arg5: memref<2x128xf32, #tpu.memory_space<vmem>>, %arg6: memref<2x128xf32, #tpu.memory_space<vmem>>, %arg7: memref<2x128xf32, #tpu.memory_space<vmem>>, %arg8: memref<2x128xf32, #tpu.memory_space<vmem>>) attributes {dimension_semantics = [#tpu.dimension_semantics<parallel>, #tpu.dimension_semantics<arbitrary>], iteration_bounds = array<i64: 2, 1>, scalar_prefetch = 0 : i64, scratch_operands = 4 : i64, tpu.core_type = #tpu.core_type<tc>, window_params = [{transform_indices = @transform_0, window_bounds = array<i64: 1, 2, 512>}, {transform_indices = @transform_1, window_bounds = array<i64: 1, 2, 512>}, {transform_indices = @transform_2, window_bounds = array<i64: 1, 8, 128>}]} {
    %c0_i32 = arith.constant 0 : i32
    %0 = arith.cmpi eq, %arg1, %c0_i32 : i32
    %1 = arith.extui %0 : i1 to i32
    %c0_i32_0 = arith.constant 0 : i32
    %2 = arith.cmpi ne, %1, %c0_i32_0 : i32
    scf.if %2 {
      %cst_29 = arith.constant 0.000000e+00 : f32
      %73 = vector.broadcast %cst_29 : f32 to vector<2x128xf32>
      %c0_30 = arith.constant 0 : index
      %c0_31 = arith.constant 0 : index
      %74 = vector.load %arg5[%c0_30, %c0_31] : memref<2x128xf32, #tpu.memory_space<vmem>>, vector<2x128xf32>
      tpu.vector_store %arg5[%c0_30, %c0_31], %73 {strides = array<i32>} : memref<2x128xf32, #tpu.memory_space<vmem>>, vector<2x128xf32>,
      %cst_32 = arith.constant 0.000000e+00 : f32
      %75 = vector.broadcast %cst_32 : f32 to vector<2x128xf32>
      %c0_33 = arith.constant 0 : index
      %c0_34 = arith.constant 0 : index
      %76 = vector.load %arg6[%c0_33, %c0_34] : memref<2x128xf32, #tpu.memory_space<vmem>>, vector<2x128xf32>
      tpu.vector_store %arg6[%c0_33, %c0_34], %75 {strides = array<i32>} : memref<2x128xf32, #tpu.memory_space<vmem>>, vector<2x128xf32>,
      %cst_35 = arith.constant 0.000000e+00 : f32
      %77 = vector.broadcast %cst_35 : f32 to vector<2x128xf32>
      %c0_36 = arith.constant 0 : index
      %c0_37 = arith.constant 0 : index
      %78 = vector.load %arg7[%c0_36, %c0_37] : memref<2x128xf32, #tpu.memory_space<vmem>>, vector<2x128xf32>
      tpu.vector_store %arg7[%c0_36, %c0_37], %77 {strides = array<i32>} : memref<2x128xf32, #tpu.memory_space<vmem>>, vector<2x128xf32>,
      %cst_38 = arith.constant 0.000000e+00 : f32
      %79 = vector.broadcast %cst_38 : f32 to vector<2x128xf32>
      %c0_39 = arith.constant 0 : index
      %c0_40 = arith.constant 0 : index
      %80 = vector.load %arg8[%c0_39, %c0_40] : memref<2x128xf32, #tpu.memory_space<vmem>>, vector<2x128xf32>
      tpu.vector_store %arg8[%c0_39, %c0_40], %79 {strides = array<i32>} : memref<2x128xf32, #tpu.memory_space<vmem>>, vector<2x128xf32>,
    } else {
    }
    %c0 = arith.constant 0 : index
    %c0_1 = arith.constant 0 : index
    %c0_2 = arith.constant 0 : index
    %3 = vector.load %arg2[%c0, %c0_1, %c0_2] : memref<1x2x512xf32, #tpu.memory_space<vmem>>, vector<1x2x512xf32>
    %4 = vector.shape_cast %3 : vector<1x2x512xf32> to vector<2x512xf32>
    %c0_3 = arith.constant 0 : index
    %c0_4 = arith.constant 0 : index
    %c0_5 = arith.constant 0 : index
    %5 = vector.load %arg3[%c0_3, %c0_4, %c0_5] : memref<1x2x512xf32, #tpu.memory_space<vmem>>, vector<1x2x512xf32>
    %6 = vector.shape_cast %5 : vector<1x2x512xf32> to vector<2x512xf32>
    %7 = math.absf %4 : vector<2x512xf32>
    %cst = arith.constant 0.000000e+00 : f32
    %8 = vector.broadcast %cst : f32 to vector<2x512xf32>
    %9 = arith.subf %8, %7 : vector<2x512xf32>
    %10 = math.exp %9 : vector<2x512xf32>
    %cst_6 = arith.constant 0.000000e+00 : f32
    %11 = vector.broadcast %cst_6 : f32 to vector<2x512xf32>
    %12 = arith.maximumf %4, %11 : vector<2x512xf32>
    %13 = arith.mulf %4, %6 : vector<2x512xf32>
    %14 = arith.subf %12, %13 : vector<2x512xf32>
    %15 = math.log1p %10 : vector<2x512xf32>
    %16 = arith.addf %14, %15 : vector<2x512xf32>
    %cst_7 = arith.constant 1.000000e+00 : f32
    %17 = vector.broadcast %cst_7 : f32 to vector<2x512xf32>
    %18 = arith.addf %17, %10 : vector<2x512xf32>
    %19 = tpu.reciprocal %18 {approx = true} : vector<2x512xf32> -> vector<2x512xf32>
    %20 = arith.mulf %18, %19 : vector<2x512xf32>
    %cst_8 = arith.constant 2.000000e+00 : f32
    %21 = vector.broadcast %cst_8 : f32 to vector<2x512xf32>
    %22 = arith.subf %21, %20 : vector<2x512xf32>
    %23 = arith.mulf %19, %22 : vector<2x512xf32>
    %cst_9 = arith.constant 0.000000e+00 : f32
    %24 = vector.broadcast %cst_9 : f32 to vector<2x512xf32>
    %25 = arith.cmpf oge, %4, %24 : vector<2x512xf32>
    %cst_10 = arith.constant 1.000000e+00 : f32
    %26 = vector.broadcast %cst_10 : f32 to vector<2x512xf32>
    %27 = arith.select %25, %26, %10 : vector<2x512xi1>, vector<2x512xf32>
    %28 = arith.mulf %27, %23 : vector<2x512xf32>
    %c0_11 = arith.constant 0 : index
    %c0_12 = arith.constant 0 : index
    %29 = vector.load %arg5[%c0_11, %c0_12] : memref<2x128xf32, #tpu.memory_space<vmem>>, vector<2x128xf32>
    %30 = arith.mulf %28, %6 : vector<2x512xf32>
    %31 = vector.extract_strided_slice %30 {offsets = [0, 0], sizes = [2, 128], strides = [1, 1]} : vector<2x512xf32> to vector<2x128xf32>
    %32 = vector.extract_strided_slice %30 {offsets = [0, 128], sizes = [2, 128], strides = [1, 1]} : vector<2x512xf32> to vector<2x128xf32>
    %33 = arith.addf %31, %32 : vector<2x128xf32>
    %34 = vector.extract_strided_slice %30 {offsets = [0, 256], sizes = [2, 128], strides = [1, 1]} : vector<2x512xf32> to vector<2x128xf32>
    %35 = arith.addf %33, %34 : vector<2x128xf32>
    %36 = vector.extract_strided_slice %30 {offsets = [0, 384], sizes = [2, 128], strides = [1, 1]} : vector<2x512xf32> to vector<2x128xf32>
    %37 = arith.addf %35, %36 : vector<2x128xf32>
    %38 = arith.addf %29, %37 : vector<2x128xf32>
    %c0_13 = arith.constant 0 : index
    %c0_14 = arith.constant 0 : index
    %39 = vector.load %arg5[%c0_13, %c0_14] : memref<2x128xf32, #tpu.memory_space<vmem>>, vector<2x128xf32>
    tpu.vector_store %arg5[%c0_13, %c0_14], %38 {strides = array<i32>} : memref<2x128xf32, #tpu.memory_space<vmem>>, vector<2x128xf32>,
    %c0_15 = arith.constant 0 : index
    %c0_16 = arith.constant 0 : index
    %40 = vector.load %arg6[%c0_15, %c0_16] : memref<2x128xf32, #tpu.memory_space<vmem>>, vector<2x128xf32>
    %41 = vector.extract_strided_slice %28 {offsets = [0, 0], sizes = [2, 128], strides = [1, 1]} : vector<2x512xf32> to vector<2x128xf32>
    %42 = vector.extract_strided_slice %28 {offsets = [0, 128], sizes = [2, 128], strides = [1, 1]} : vector<2x512xf32> to vector<2x128xf32>
    %43 = arith.addf %41, %42 : vector<2x128xf32>
    %44 = vector.extract_strided_slice %28 {offsets = [0, 256], sizes = [2, 128], strides = [1, 1]} : vector<2x512xf32> to vector<2x128xf32>
    %45 = arith.addf %43, %44 : vector<2x128xf32>
    %46 = vector.extract_strided_slice %28 {offsets = [0, 384], sizes = [2, 128], strides = [1, 1]} : vector<2x512xf32> to vector<2x128xf32>
    %47 = arith.addf %45, %46 : vector<2x128xf32>
    %48 = arith.addf %40, %47 : vector<2x128xf32>
    %c0_17 = arith.constant 0 : index
    %c0_18 = arith.constant 0 : index
    %49 = vector.load %arg6[%c0_17, %c0_18] : memref<2x128xf32, #tpu.memory_space<vmem>>, vector<2x128xf32>
    tpu.vector_store %arg6[%c0_17, %c0_18], %48 {strides = array<i32>} : memref<2x128xf32, #tpu.memory_space<vmem>>, vector<2x128xf32>,
    %c0_19 = arith.constant 0 : index
    %c0_20 = arith.constant 0 : index
    %50 = vector.load %arg7[%c0_19, %c0_20] : memref<2x128xf32, #tpu.memory_space<vmem>>, vector<2x128xf32>
    %51 = vector.extract_strided_slice %6 {offsets = [0, 0], sizes = [2, 128], strides = [1, 1]} : vector<2x512xf32> to vector<2x128xf32>
    %52 = vector.extract_strided_slice %6 {offsets = [0, 128], sizes = [2, 128], strides = [1, 1]} : vector<2x512xf32> to vector<2x128xf32>
    %53 = arith.addf %51, %52 : vector<2x128xf32>
    %54 = vector.extract_strided_slice %6 {offsets = [0, 256], sizes = [2, 128], strides = [1, 1]} : vector<2x512xf32> to vector<2x128xf32>
    %55 = arith.addf %53, %54 : vector<2x128xf32>
    %56 = vector.extract_strided_slice %6 {offsets = [0, 384], sizes = [2, 128], strides = [1, 1]} : vector<2x512xf32> to vector<2x128xf32>
    %57 = arith.addf %55, %56 : vector<2x128xf32>
    %58 = arith.addf %50, %57 : vector<2x128xf32>
    %c0_21 = arith.constant 0 : index
    %c0_22 = arith.constant 0 : index
    %59 = vector.load %arg7[%c0_21, %c0_22] : memref<2x128xf32, #tpu.memory_space<vmem>>, vector<2x128xf32>
    tpu.vector_store %arg7[%c0_21, %c0_22], %58 {strides = array<i32>} : memref<2x128xf32, #tpu.memory_space<vmem>>, vector<2x128xf32>,
    %c0_23 = arith.constant 0 : index
    %c0_24 = arith.constant 0 : index
    %60 = vector.load %arg8[%c0_23, %c0_24] : memref<2x128xf32, #tpu.memory_space<vmem>>, vector<2x128xf32>
    %61 = vector.extract_strided_slice %16 {offsets = [0, 0], sizes = [2, 128], strides = [1, 1]} : vector<2x512xf32> to vector<2x128xf32>
    %62 = vector.extract_strided_slice %16 {offsets = [0, 128], sizes = [2, 128], strides = [1, 1]} : vector<2x512xf32> to vector<2x128xf32>
    %63 = arith.addf %61, %62 : vector<2x128xf32>
    %64 = vector.extract_strided_slice %16 {offsets = [0, 256], sizes = [2, 128], strides = [1, 1]} : vector<2x512xf32> to vector<2x128xf32>
    %65 = arith.addf %63, %64 : vector<2x128xf32>
    %66 = vector.extract_strided_slice %16 {offsets = [0, 384], sizes = [2, 128], strides = [1, 1]} : vector<2x512xf32> to vector<2x128xf32>
    %67 = arith.addf %65, %66 : vector<2x128xf32>
    %68 = arith.addf %60, %67 : vector<2x128xf32>
    %c0_25 = arith.constant 0 : index
    %c0_26 = arith.constant 0 : index
    %69 = vector.load %arg8[%c0_25, %c0_26] : memref<2x128xf32, #tpu.memory_space<vmem>>, vector<2x128xf32>
    tpu.vector_store %arg8[%c0_25, %c0_26], %68 {strides = array<i32>} : memref<2x128xf32, #tpu.memory_space<vmem>>, vector<2x128xf32>,
    %c0_i32_27 = arith.constant 0 : i32
    %70 = arith.cmpi eq, %arg1, %c0_i32_27 : i32
    %71 = arith.extui %70 : i1 to i32
    %c0_i32_28 = arith.constant 0 : i32
    %72 = arith.cmpi ne, %71, %c0_i32_28 : i32
    scf.if %72 {
      %c0_29 = arith.constant 0 : index
      %c0_30 = arith.constant 0 : index
      %73 = vector.load %arg5[%c0_29, %c0_30] : memref<2x128xf32, #tpu.memory_space<vmem>>, vector<2x128xf32>
      %74 = vector.shape_cast %73 : vector<2x128xf32> to vector<1x2x128xf32>
      %cst_31 = arith.constant dense<0.000000e+00> : vector<1xf32>
      %75 = vector.multi_reduction <add>, %74, %cst_31 [1, 2] : vector<1x2x128xf32> to vector<1xf32>
      %76 = vector.shape_cast %75 : vector<1xf32> to vector<1x1x1xf32>
      %77 = vector.extract %76[0, 0, 0] : f32 from vector<1x1x1xf32>
      %c0_32 = arith.constant 0 : index
      %c0_33 = arith.constant 0 : index
      %78 = vector.load %arg6[%c0_32, %c0_33] : memref<2x128xf32, #tpu.memory_space<vmem>>, vector<2x128xf32>
      %79 = vector.shape_cast %78 : vector<2x128xf32> to vector<1x2x128xf32>
      %cst_34 = arith.constant dense<0.000000e+00> : vector<1xf32>
      %80 = vector.multi_reduction <add>, %79, %cst_34 [1, 2] : vector<1x2x128xf32> to vector<1xf32>
      %81 = vector.shape_cast %80 : vector<1xf32> to vector<1x1x1xf32>
      %82 = vector.extract %81[0, 0, 0] : f32 from vector<1x1x1xf32>
      %c0_35 = arith.constant 0 : index
      %c0_36 = arith.constant 0 : index
      %83 = vector.load %arg7[%c0_35, %c0_36] : memref<2x128xf32, #tpu.memory_space<vmem>>, vector<2x128xf32>
      %84 = vector.shape_cast %83 : vector<2x128xf32> to vector<1x2x128xf32>
      %cst_37 = arith.constant dense<0.000000e+00> : vector<1xf32>
      %85 = vector.multi_reduction <add>, %84, %cst_37 [1, 2] : vector<1x2x128xf32> to vector<1xf32>
      %86 = vector.shape_cast %85 : vector<1xf32> to vector<1x1x1xf32>
      %87 = vector.extract %86[0, 0, 0] : f32 from vector<1x1x1xf32>
      %c0_38 = arith.constant 0 : index
      %c0_39 = arith.constant 0 : index
      %88 = vector.load %arg8[%c0_38, %c0_39] : memref<2x128xf32, #tpu.memory_space<vmem>>, vector<2x128xf32>
      %89 = vector.shape_cast %88 : vector<2x128xf32> to vector<1x2x128xf32>
      %cst_40 = arith.constant dense<0.000000e+00> : vector<1xf32>
      %90 = vector.multi_reduction <add>, %89, %cst_40 [1, 2] : vector<1x2x128xf32> to vector<1xf32>
      %91 = vector.shape_cast %90 : vector<1xf32> to vector<1x1x1xf32>
      %92 = vector.extract %91[0, 0, 0] : f32 from vector<1x1x1xf32>
      %93 = tpu.iota {dimensions = array<i32: 0>} : vector<8x128xi32>
      %94 = tpu.iota {dimensions = array<i32: 1>} : vector<8x128xi32>
      %c0_i32_41 = arith.constant 0 : i32
      %95 = vector.broadcast %c0_i32_41 : i32 to vector<8x128xi32>
      %96 = arith.cmpi eq, %93, %95 : vector<8x128xi32>
      %c0_i32_42 = arith.constant 0 : i32
      %97 = vector.broadcast %c0_i32_42 : i32 to vector<8x128xi32>
      %98 = arith.cmpi eq, %94, %97 : vector<8x128xi32>
      %99 = arith.andi %96, %98 : vector<8x128xi1>
      %cst_43 = arith.constant 0.000000e+00 : f32
      %100 = vector.broadcast %77 : f32 to vector<8x128xf32>
      %101 = vector.broadcast %cst_43 : f32 to vector<8x128xf32>
      %102 = arith.select %99, %100, %101 : vector<8x128xi1>, vector<8x128xf32>
      %c0_i32_44 = arith.constant 0 : i32
      %103 = vector.broadcast %c0_i32_44 : i32 to vector<8x128xi32>
      %104 = arith.cmpi eq, %93, %103 : vector<8x128xi32>
      %c1_i32 = arith.constant 1 : i32
      %105 = vector.broadcast %c1_i32 : i32 to vector<8x128xi32>
      %106 = arith.cmpi eq, %94, %105 : vector<8x128xi32>
      %107 = arith.andi %104, %106 : vector<8x128xi1>
      %108 = vector.broadcast %82 : f32 to vector<8x128xf32>
      %109 = arith.select %107, %108, %102 : vector<8x128xi1>, vector<8x128xf32>
      %c0_i32_45 = arith.constant 0 : i32
      %110 = vector.broadcast %c0_i32_45 : i32 to vector<8x128xi32>
      %111 = arith.cmpi eq, %93, %110 : vector<8x128xi32>
      %c2_i32 = arith.constant 2 : i32
      %112 = vector.broadcast %c2_i32 : i32 to vector<8x128xi32>
      %113 = arith.cmpi eq, %94, %112 : vector<8x128xi32>
      %114 = arith.andi %111, %113 : vector<8x128xi1>
      %115 = vector.broadcast %87 : f32 to vector<8x128xf32>
      %116 = arith.select %114, %115, %109 : vector<8x128xi1>, vector<8x128xf32>
      %c0_i32_46 = arith.constant 0 : i32
      %117 = vector.broadcast %c0_i32_46 : i32 to vector<8x128xi32>
      %118 = arith.cmpi eq, %93, %117 : vector<8x128xi32>
      %c3_i32 = arith.constant 3 : i32
      %119 = vector.broadcast %c3_i32 : i32 to vector<8x128xi32>
      %120 = arith.cmpi eq, %94, %119 : vector<8x128xi32>
      %121 = arith.andi %118, %120 : vector<8x128xi1>
      %122 = vector.broadcast %92 : f32 to vector<8x128xf32>
      %123 = arith.select %121, %122, %116 : vector<8x128xi1>, vector<8x128xf32>
      %c0_47 = arith.constant 0 : index
      %c0_48 = arith.constant 0 : index
      %c0_49 = arith.constant 0 : index
      %124 = vector.load %arg4[%c0_47, %c0_48, %c0_49] : memref<1x8x128xf32, #tpu.memory_space<vmem>>, vector<1x8x128xf32>
      %125 = vector.shape_cast %124 : vector<1x8x128xf32> to vector<8x128xf32>
      %126 = vector.shape_cast %123 : vector<8x128xf32> to vector<1x8x128xf32>
      tpu.vector_store %arg4[%c0_47, %c0_48, %c0_49], %126 {strides = array<i32>} : memref<1x8x128xf32, #tpu.memory_space<vmem>>, vector<1x8x128xf32>,
    } else {
    }
    return
  }
  func.func @transform_0(%arg0: i32, %arg1: i32) -> (i32, i32, i32) {
    %c0_i32 = arith.constant 0 : i32
    %c0_i32_0 = arith.constant 0 : i32
    return %arg0, %arg1, %c0_i32 : i32, i32, i32
  }
  func.func @transform_1(%arg0: i32, %arg1: i32) -> (i32, i32, i32) {
    %c0_i32 = arith.constant 0 : i32
    %c0_i32_0 = arith.constant 0 : i32
    return %arg0, %arg1, %c0_i32 : i32, i32, i32
  }
  func.func @transform_2(%arg0: i32, %arg1: i32) -> (i32, i32, i32) {
    %c0_i32 = arith.constant 0 : i32
    %c0_i32_0 = arith.constant 0 : i32
    %c0_i32_1 = arith.constant 0 : i32
    return %arg0, %c0_i32, %c0_i32_0 : i32, i32, i32
  }
}

</mosaic_0001>

<bundles_post_ra>
// kernel: tpu_custom_call.1
= control target key start
LH: loop header
LB: loop body
LE: loop exit
PB: predicated region body
PF: predicated region fallthrough
CT: control target
= control target key end

     0   :  { %7 = vsyncpa [#allocation7], 0  ;;  %s913_s0 = inlined_call_operand.hbm [shape: f32[2,2,512], index: 0, kind: input, shape index: {}]   ;;  %s914_s1 = inlined_call_operand.hbm [shape: f32[2,2,512], index: 1, kind: input, shape index: {}]   ;;  %s915_s2 = inlined_call_operand.hbm [shape: f32[2,8,128], index: 2, kind: output, shape index: {}]  }
   0x1   :  { %9 = vsyncpa [#allocation7 + $0x1], 0 }
   0x2   :  { %10 = vsyncpa [#allocation10], 0 }
   0x3   :  { %12 = vsyncpa [#allocation10 + $0x1], 0 }
   0x4   :  { %13 = vsyncpa [#allocation8], 0 }
   0x5   :  { %15 = vsyncpa [#allocation8 + $0x1], 0  ;;  %s769_s9 = smov 0   ;;  %s771_s10 = smov 0  }
   0x6   :  { %s773_s11 = smov 0   ;;  %s775_s12 = smov 0  }
   0x7   :  { %s777_s13 = smov 0   ;;  %s779_s14 = smov 0  }
   0x8 LB: > { %s503_s15 = sadd.s32 4294967295, %s751_s14   ;;  %s504_s16 = sadd.s32 4294967294, %s751_s14   ;;  %s751_s14 = sphi %s779_s14, %s21_s14   ;;  %s747_s13 = sphi %s777_s13, %s924_s13   ;;  %s743_s12 = sphi %s775_s12, %s923_s12   ;;  %s739_s11 = sphi %s773_s11, %s922_s11   ;;  %s735_s10 = sphi %s771_s10, %s921_s10   ;;  %s731_s9 = sphi %s769_s9, %s920_s9  }
   0x9   : > { %s33_s17 = sadd.s32 1, %s747_s13  ;;  %s42_s18 = sadd.s32 1, %s739_s11 }
   0xa   : > { %p35_p0 = scmp.ge.s32.totalorder %s33_s17, 2  ;;  %p49_p1 = scmp.ne.s32.totalorder %s739_s11, %s735_s10 }
   0xb   : > { %p50_p2 = scmp.eq.s32.totalorder %s751_s14, 0  ;;  %p55_p3 = scmp.ne.s32.totalorder %s735_s10, %s731_s9 }
   0xc   : > { %s926_s17 = smov (%p35_p0, %s33_s17), 0  ;;  %p56_p5 = scmp.eq.s32.totalorder %s503_s15, 0 }
   0xd   : > { %p810_p4 = por %p50_p2, %p49_p1  ;;  %s37_s20 = ssub.s32 %s747_s13, %s926_s17 }
   0xe   : > { %p107_p6 = scmp.eq.s32.totalorder %s503_s15, 1  ;;  %p40_p7 = scmp.eq.s32.totalorder %s37_s20, 0 }
   0xf   : > { %p816_p8 = por %p56_p5, %p55_p3  ;;  %p113_p10 = scmp.eq.s32.totalorder %s504_s16, 1 }
  0x10   : > { %p820_p9 = por %p107_p6, %p49_p1  ;;  %p506_p12 = scmp.ge.s32.totalorder %s751_s14, 2 }
  0x11   : > { %s825_s23 = scalar_select %p40_p7, %s739_s11, %s42_s18  }
  0x12   : > { %p827_p11 = por %p113_p10, %p55_p3  ;;  %p548_p13 = scmp.lt.s32.totalorder %s751_s14, 2 }
  0x13   : > { %s133_s25 = sand.u32 1, %s739_s11   ;;  %s521_s27 = sshll.u32 %s747_s13, 3 }
  0x14   : > { %s507_s26 = sshll.u32 %s133_s25, 3  ;;  %s144_s30 = scalar_lea.hbm %s913_s0, %s521_s27 }
  0x15   : > { %s137_s3 = scalar_lea.vmem [#allocation6], %s507_s26  ;;  %s146_s5 = sshll.u32 %s144_s30, 4  ;;  %s147_s5 = int_to_ptr.hbm [resolvable:$true] %s146_s5 }
  0x16   : > { %s148_s4 = sshll.u32 %s137_s3, 4  ;;  %p538_p0 = pnand %p548_p13, %p810_p4  ;;  %s149_s4 = int_to_ptr.vmem [resolvable:$true] %s148_s4 }
  0x17   : > { %p513_p1 = scmp.ge.s32.totalorder %s751_s14, 1  ;;  %p175_p2 = scmp.lt.s32.totalorder %s751_s14, 3 }
  0x18   : > { %s134_s6 = scalar_lea.sflag [#allocation7], %s133_s25  ;;  %s166_s15 = scalar_lea.hbm %s914_s1, %s521_s27 }
  0x19   : > { %540 = dma.hbm_to_vmem [thread:$0]  (!%p538_p0), %s147_s5, 128, %s149_s4, %s134_s6  }
  0x1a   : > { %p176_p3 = pnand %p513_p1, %p175_p2  ;;  %s159_s16 = scalar_lea.vmem [#allocation9], %s507_s26 }
  0x1b   : > { %s170_s18 = sshll.u32 %s159_s16, 4  ;;  %s168_s20 = sshll.u32 %s166_s15, 4  ;;  %s171_s18 = int_to_ptr.vmem [resolvable:$true] %s170_s18  ;;  %s169_s20 = int_to_ptr.hbm [resolvable:$true] %s168_s20 }
  0x1c   : > { %s156_s28 = scalar_lea.sflag [#allocation10], %s133_s25  ;;  %179 = sbr.rel (%p176_p3) target bundleno = 281 (0x119), region = 28 }
  0x1d   : > { %543 = dma.hbm_to_vmem [thread:$0]  (!%p538_p0), %s169_s20, 128, %s171_s18, %s156_s28  }
  0x1e   : > { %s846_s19 = sand.u32 (!%p176_p3), 1, %s735_s10  }
  0x1f   : > { %s849_s29 = sshll.u32 (!%p176_p3), %s846_s19, 3  ;;  %s182_s30 = scalar_lea.sflag (!%p176_p3), [#allocation7], %s846_s19 }
  0x20   : > { %s185_s3 = scalar_lea.vmem (!%p176_p3), [#allocation6], %s849_s29 }
  0x21   : > { %718 = dma.done.wait (%p816_p8), %s182_s30, 128  }
  0x22   : > { %720 = vsyncadd (%p816_p8), %s182_s30, 4294967168  ;;  %s192_s25 = scalar_lea.sflag [#allocation10], %s846_s19  ;;  %s195_s26 = scalar_lea.vmem [#allocation9], %s849_s29 }
  0x23   : > { %722 = dma.done.wait (%p816_p8), %s192_s25, 128  }
  0x24   : > { %724 = vsyncadd (%p816_p8), %s192_s25, 4294967168  ;;  %v753_v0 = vmov 0.0   ;;  %v231_v1 = vld [vmem:[%s195_s26] sm:$0xff]  ;;  %v230_v2 = vld [vmem:[%s185_s3] sm:$0xff]  ;;  %vm314_vm0 = vcmask 1041408   ;;  %s518_s21 = sshll.u32 %s743_s12, 3 }
  0x25   : > { %228 = vst [vmem:[#allocation4] sm:$0x3] %v753_v0  ;;  %v286_v3 = vrot.slane %v231_v1, 2  ;;  %v289_v4 = vrot.slane %v231_v1, 4  ;;  %v232_v5 = vand.u32 2147483647, %v230_v2  ;;  %v237_v21 = vmul.f32 %v231_v1, %v230_v2  ;;  %s391_s6 = scalar_lea.hbm %s915_s2, %s518_s21 }
  0x26   : > { %226 = vst [vmem:[#allocation2] sm:$0x3] %v753_v0  ;;  %v292_v7 = vrot.slane %v231_v1, 6  ;;  %v236_v20 = vmax.f32 %v230_v2, 0.0  ;;  %vm254_vm1 = vcmp.ge.f32.partialorder %v230_v2, 0.0  ;;  %s221_s7 = scalar_lea.vmem [#allocation11], %s849_s29 }
  0x27   : > { %227 = vst [vmem:[#allocation3] sm:$0x3] %v753_v0  ;;  %v288_v6 = vadd.f32 %v286_v3, %v231_v1  ;;  %v233_v8 = vsub.f32 0.0, %v232_v5  ;;  %s874_s8 = sshll.u32 %s221_s7, 4  ;;  %s395_s15 = sshll.u32 %s391_s6, 4  ;;  %s394_s8 = int_to_ptr.vmem [resolvable:$true] %s874_s8  ;;  %s396_s15 = int_to_ptr.hbm [resolvable:$true] %s395_s15 }
  0x28   : > { %229 = vst [vmem:[#allocation5] sm:$0x3] %v753_v0  ;;  %v238_v27 = vsub.f32 %v236_v20, %v237_v21  ;;  %s381_s20 = scalar_lea.sflag [#allocation8], %s846_s19  ;;  %s679_s28 = sshra.s32 %s396_s15, 4  ;;  %s680_s28 = int_to_ptr.hbm [resolvable:$true] %s679_s28 }
  0x29   : > { %v291_v9 = vadd.f32 %v289_v4, %v288_v6  ;;  %v234_v11 = vmul.f32 1.442695, %v233_v8  ;;  %s681_s29 = scalar_lea.hbm %s680_s28, 8  ;;  %s685_s25 = scalar_lea.hbm %s915_s2, 16 }
  0x2a   : > { %p682_p4 = scmp.ne.s32.totalorder %s680_s28, %s681_s29  ;;  %p686_p7 = scmp.lt.s32.totalorder %s680_s28, %s915_s2 }
  0x2b   : > { %v294_v12 = vadd.f32 %v292_v7, %v291_v9  ;;  %599 = vpow2.f32 %v234_v11  ;;  %p687_p8 = scmp.lt.s32.totalorder %s685_s25, %s681_s29 }
  0x2c   : > { %v284_v10 = vld [vmem:[#allocation4] sm:$0x3]  ;;  %p683_p5 = pnand %p682_p4, %p820_p9 }
  0x2d   : > { %v295_v13 = vadd.f32 %v294_v12, %v284_v10  ;;  %v257_v55 = vld [vmem:[#allocation2] sm:$0x3]  ;;  %p688_p10 = por %p687_p8, %p686_p7 }
  0x2e   : > { %v271_v54 = vld [vmem:[#allocation3] sm:$0x3]  ;;  %p684_p6 = pneg %p683_p5 }
  0x2f   : > { %296 = vst [vmem:[#allocation4] sm:$0x3] %v295_v13  ;;  %v297_v45 = vld [vmem:[#allocation5] sm:$0x3] }
  0x30   : > { %p689_p13 = pnand %p688_p10, %p684_p6 }
  0x31   : > { %v600_v14 = vpop.eup %599 }
  0x32   : > { %v239_v15 = vadd.f32 1.0, %v600_v14  ;;  %v242_v16 = vmul.f32 -0.5, %v600_v14  ;;  %v245_v22 = vand.u32 2147483647, %v600_v14  ;;  %v255_v30 = vsel %vm254_vm1, 1.0, %v600_v14 }
  0x34   : > { %601 = vrcp.f32 %v239_v15  ;;  %v243_v19 = vadd.f32 1.0, %v242_v16  ;;  %vm246_vm2 = vcmp.lt.f32.partialorder %v245_v22, 0.0004427343 }
  0x35   : > { %603 = vlog2.f32 %v239_v15 }
  0x36   : > { %v336_v17 = vld [vmem:[#allocation4] sm:$0x3]  ;;  %v244_v24 = vmul.f32 %v600_v14, %v243_v19 }
  0x37   : > { %v337_v18 = vsel %vm314_vm0, %v336_v17, 0.0 }
  0x38   : > { %338 = vadd.xlane.f32.xlu1 %v337_v18 }
  0x3a   : > { %v602_v23 = vpop.eup %601 }
  0x3b   : > { %v604_v25 = vpop.eup %603  ;;  %v251_v26 = vmul.f32 %v602_v23, %v239_v15 }
  0x3c   : > { %v241_v28 = vmul.f32 0.6931472, %v604_v25 }
  0x3d   : > { %v252_v29 = vsub.f32 2.0, %v251_v26 }
  0x3e   : > { %v247_v31 = vsel %vm246_vm2, %v244_v24, %v241_v28 }
  0x3f   : > { %v253_v32 = vmul.f32 %v602_v23, %v252_v29  ;;  %v248_v33 = vadd.f32 %v247_v31, %v238_v27 }
  0x41   : > { %v256_v34 = vmul.f32 %v255_v30, %v253_v32  ;;  %v299_v35 = vrot.slane %v248_v33, 2  ;;  %v302_v36 = vrot.slane %v248_v33, 4  ;;  %v305_v39 = vrot.slane %v248_v33, 6 }
  0x42   : > { %v358_v30 = vlaneseq }
  0x43   : > { %v258_v37 = vmul.f32 %v256_v34, %v231_v1  ;;  %v301_v38 = vadd.f32 %v299_v35, %v248_v33  ;;  %v273_v40 = vrot.slane %v256_v34, 2  ;;  %v276_v41 = vrot.slane %v256_v34, 4 }
  0x44   : > { %v279_v47 = vrot.slane %v256_v34, 6  ;;  %v359_v31 = vshrl.u32 %v358_v30, 7  ;;  %v361_v32 = vand.u32 127, %v358_v30 }
  0x45   : > { %v260_v42 = vrot.slane %v258_v37, 2  ;;  %v263_v43 = vrot.slane %v258_v37, 4  ;;  %v304_v44 = vadd.f32 %v302_v36, %v301_v38  ;;  %v275_v46 = vadd.f32 %v273_v40, %v256_v34 }
  0x46   : > { %v266_v49 = vrot.slane %v258_v37, 6  ;;  %vm362_vm3 = vcmp.eq.s32.totalorder %v359_v31, 0  ;;  %vm363_vm4 = vcmp.eq.s32.totalorder %v361_v32, 0  ;;  %vm367_vm5 = vcmp.eq.s32.totalorder %v361_v32, 1 }
  0x47   : > { %v262_v48 = vadd.f32 %v260_v42, %v258_v37  ;;  %v307_v50 = vadd.f32 %v305_v39, %v304_v44  ;;  %v278_v51 = vadd.f32 %v276_v41, %v275_v46  ;;  %vm371_vm6 = vcmp.eq.s32.totalorder %v361_v32, 2  ;;  %vm364_vm7 = vmand %vm362_vm3, %vm363_vm4 }
  0x48   : > { %vm375_vm8 = vcmp.eq.s32.totalorder %v361_v32, 3  ;;  %vm368_vm9 = vmand %vm362_vm3, %vm367_vm5 }
  0x49   : > { %v265_v52 = vadd.f32 %v263_v43, %v262_v48  ;;  %v308_v53 = vadd.f32 %v307_v50, %v297_v45  ;;  %v281_v56 = vadd.f32 %v279_v47, %v278_v51  ;;  %vm372_vm10 = vmand %vm362_vm3, %vm371_vm6 }
  0x4a   : > { %vm376_vm11 = vmand %vm362_vm3, %vm375_vm8 }
  0x4b   : > { %v268_v57 = vadd.f32 %v266_v49, %v265_v52  ;;  %309 = vst [vmem:[#allocation5] sm:$0x3] %v308_v53  ;;  %v282_v58 = vadd.f32 %v281_v56, %v271_v54 }
  0x4d   : > { %v269_v59 = vadd.f32 %v268_v57, %v257_v55  ;;  %283 = vst [vmem:[#allocation3] sm:$0x3] %v282_v58 }
  0x4f   : > { %270 = vst [vmem:[#allocation2] sm:$0x3] %v269_v59 }
  0x52   : > { %v347_v60 = vld [vmem:[#allocation5] sm:$0x3] }
  0x53   : > { %v348_v61 = vsel %vm314_vm0, %v347_v60, 0.0 }
  0x54   : > { %349 = vadd.xlane.f32.xlu1 %v348_v61  ;;  %v325_v0 = vld [vmem:[#allocation3] sm:$0x3] }
  0x55   : > { %v326_v1 = vsel %vm314_vm0, %v325_v0, 0.0 }
  0x56   : > { %v313_v62 = vld [vmem:[#allocation2] sm:$0x3] }
  0x57   : > { %v315_v63 = vsel %vm314_vm0, %v313_v62, 0.0 }
  0x58   : > { %316 = vadd.xlane.f32.xlu0 %v315_v63 }
  0x60   : > { %327 = vadd.xlane.f32.xlu0 %v326_v1 }
  0xab   : > { %v339_v2 = vpop.xlane.xlu1 %338 }
  0xac   : > { %v340_v4 = vrot.slane %v339_v2, 4 }
  0xae   : > { %v341_v9 = vadd.f32 %v340_v4, %v339_v2 }
  0xb0   : > { %v342_v13 = vrot.slane %v341_v9, 2 }
  0xb2   : > { %v343_v20 = vadd.f32 %v342_v13, %v341_v9 }
  0xb4   : > { %v344_v24 = vrot.slane %v343_v20, 1 }
  0xb6   : > { %v345_v28 = vadd.f32 %v344_v24, %v343_v20 }
  0xc7   : > { %v350_v3 = vpop.xlane.xlu1 %349 }
  0xc8   : > { %v351_v7 = vrot.slane %v350_v3, 4 }
  0xca   : > { %v352_v11 = vadd.f32 %v351_v7, %v350_v3 }
  0xcb   : > { %v317_v5 = vpop.xlane.xlu0 %316 }
  0xcc   : > { %v318_v6 = vrot.slane %v317_v5, 4  ;;  %v353_v15 = vrot.slane %v352_v11, 2 }
  0xce   : > { %v319_v8 = vadd.f32 %v318_v6, %v317_v5  ;;  %v354_v21 = vadd.f32 %v353_v15, %v352_v11 }
  0xd0   : > { %v320_v10 = vrot.slane %v319_v8, 2  ;;  %v355_v26 = vrot.slane %v354_v21, 1 }
  0xd2   : > { %v321_v12 = vadd.f32 %v320_v10, %v319_v8  ;;  %v356_v29 = vadd.f32 %v355_v26, %v354_v21 }
  0xd3   : > { %v328_v14 = vpop.xlane.xlu0 %327 }
  0xd4   : > { %v329_v16 = vrot.slane %v328_v14, 4  ;;  %v322_v17 = vrot.slane %v321_v12, 1 }
  0xd6   : > { %v330_v18 = vadd.f32 %v329_v16, %v328_v14  ;;  %v323_v19 = vadd.f32 %v322_v17, %v321_v12 }
  0xd8   : > { %v331_v22 = vrot.slane %v330_v18, 2  ;;  %523 = vpush %v323_v19 }
  0xda   : > { %v332_v23 = vadd.f32 %v331_v22, %v330_v18 }
  0xdc   : > { %v333_v25 = vrot.slane %v332_v23, 1 }
  0xde   : > { %v334_v27 = vadd.f32 %v333_v25, %v332_v23 }
  0xe0   : > { %525 = vpush %v334_v27 }
  0xe1   : > { %527 = vpush %v345_v28 }
  0xe2   : > { %529 = vpush %v356_v29 }
 0x109   : > { %s524_s27 = spop %523 }
 0x10a   : > { %v365_v33 = vstv %s524_s27 }
 0x10b   : > { %v366_v34 = vsel %vm364_vm7, %v365_v33, 0.0 }
 0x111   : > { %s526_s12 = spop %525 }
 0x112   : > { %v369_v35 = vstv %s526_s12  ;;  %s528_s16 = spop %527 }
 0x113   : > { %v370_v36 = vsel %vm368_vm9, %v369_v35, %v366_v34  ;;  %v373_v37 = vstv %s528_s16  ;;  %s530_s18 = spop %529 }
 0x114   : > { %v374_v38 = vsel %vm372_vm10, %v373_v37, %v370_v36  ;;  %v377_v39 = vstv %s530_s18 }
 0x115   : > { %v378_v40 = vsel %vm376_vm11, %v377_v39, %v374_v38 }
 0x116   : > { %379 = vst [vmem:[%s221_s7] sm:$0xff] %v378_v40 }
 0x117   : > { %692 = shalt.err (!%p689_p13)
}
 0x118   : > { %535 = dma.vmem_to_hbm [thread:$0]  (%p820_p9), %s394_s8, 128, %s396_s15, %s381_s20  }
 0x119 PF: > { %s407_s19 = sand.u32 1, %s731_s9   ;;  %p545_p0 = pnand %p506_p12, %p827_p11 }
 0x11a   : > { %s408_s27 = scalar_lea.sflag [#allocation8], %s407_s19 }
 0x11b   : > { %p546_p1 = pneg %p545_p0 }
 0x11d   : > { %726 = dma.done.wait (%p546_p1), %s408_s27, 128  }
 0x11e   : > { %728 = vsyncadd (%p546_p1), %s408_s27, 4294967168  ;;  %s21_s14 = sadd.s32 1, %s751_s14   ;;  %s920_s9 = smov %s735_s10 }
 0x11f   : > { %p18_p2 = scmp.ge.s32.totalorder %s21_s14, 4   ;;  %s921_s10 = smov %s739_s11 }
 0x120   : > { %s922_s11 = smov %s825_s23  ;;  %s923_s12 = smov %s747_s13 }
 0x121   : > { %s924_s13 = smov %s926_s17  ;;  %20 = sbr.rel (!%p18_p2) target bundleno = 8 (0x8), region = 94 }
 0x126   :  { %414 = vsyncpa [#allocation7], 1 }
 0x127   :  { %416 = vsyncpa [#allocation7 + $0x1], 1 }
 0x128   :  { %417 = vsyncpa [#allocation10], 1 }
 0x129   :  { %419 = vsyncpa [#allocation10 + $0x1], 1 }
 0x12a   :  { %420 = vsyncpa [#allocation8], 1 }
 0x12b   :  { %422 = vsyncpa [#allocation8 + $0x1], 1 }

</bundles_post_ra>
